<compile_context>
chip_gen: v6e
topology: v6e:2x2x1
jax: 0.10.0
libtpu: 0.0.40
codegen_flags: <defaults>
</compile_context>

<pallas_src>
import functools

import jax
import jax.numpy as jnp
from jax.experimental import pallas as pl
from jax.experimental.pallas import tpu as pltpu


def ca_block_kernel(x_ref, w1b_ref, whb_ref, wwb_ref, phw_ref, eh_ref, ew_ref,
                    o_ref, *, H, W):
    # x_ref  : (nb*C, H*W)      nb batch elements, channels on sublanes, H*W on lanes
    # w1b_ref: (nb*mid, nb*C)   block-diagonal conv_1x1 weight (all nb batches at once)
    # whb_ref: (nb*C, nb*mid)   block-diagonal F_h weight
    # wwb_ref: (nb*C, nb*mid)   block-diagonal F_w weight
    # phw_ref: (H*W, H+W)       fused [mean-over-W | mean-over-H] pooling matrix
    # eh_ref : (H, H*W)         h-gate expansion matrix, eh[h, h*W + w] = 1
    # ew_ref : (W, H*W)         w-gate expansion matrix, ew[w, h*W + w] = 1
    x = x_ref[...]
    gd = x.dtype                     # dtype of all wide (H*W-lane) temporaries

    # ---- coordinate pooling -------------------------------------------------
    # AdaptiveAvgPool2d((H,1)) and ((1,W)) as ONE MXU matmul against the fused
    # constant pooling matrix; replaces strided lane slice-adds with an MXU
    # push that has plenty of slack in this memory-bound kernel.
    pooled = jnp.dot(x, phw_ref[...],
                     preferred_element_type=jnp.float32)          # (nb*C, H+W) f32

    # ---- shared 1x1 conv + ReLU on the concatenated [x_h | x_w] -------------
    # One matmul for all nb batch elements via the block-diagonal weight.
    y = jnp.maximum(
        jnp.dot(w1b_ref[...], pooled, preferred_element_type=jnp.float32),
        0.0)                                                      # (nb*mid, H+W)

    # ---- split at lane offset H, per-axis 1x1 conv + sigmoid ----------------
    s_h = jax.nn.sigmoid(
        jnp.dot(whb_ref[...], y[:, :H], preferred_element_type=jnp.float32))  # (nb*C, H)
    s_w = jax.nn.sigmoid(
        jnp.dot(wwb_ref[...], y[:, H:], preferred_element_type=jnp.float32))  # (nb*C, W)

    # ---- expand gates back to the H*W lane axis and rescale -----------------
    # Both expansions are tiny MXU matmuls against constant 0/1 matrices
    # (no lane concat / masked lane writes); gate slabs stay in the streaming
    # dtype so the bf16 path never materializes a full f32 block copy.
    g_h = jnp.dot(s_h.astype(gd), eh_ref[...], preferred_element_type=gd)  # (nb*C, HW)
    g_w = jnp.dot(s_w.astype(gd), ew_ref[...], preferred_element_type=gd)  # (nb*C, HW)

    o_ref[...] = (x * g_h * g_w).astype(o_ref.dtype)


def _vmem_footprint_bytes(nb, C, H, W, mid, itemsize):
    """Honest per-step VMEM estimate: pipeline buffers + in-kernel temporaries."""
    HW = H * W
    blk = nb * C * HW * itemsize
    io_bufs = 4 * blk                          # double-buffered input + output blocks
    gates = 2 * blk                            # g_h, g_w slabs (streaming dtype)
    fused = nb * C * HW * 4                    # headroom for one f32-wide fused temp
    weights = 3 * (nb * mid) * (nb * C) * 4    # block-diagonal 1x1-conv weights (f32)
    consts = 2 * HW * (H + W) * itemsize       # phw + eh + ew
    small = 4 * nb * C * (H + W) * 4           # pooled / y / s_h / s_w
    return io_bufs + gates + fused + 2 * (weights + consts) + small + (2 << 20)


def _choose_block_batch(N, C, H, W, mid, itemsize, target_bytes, sub_mult,
                        vmem_budget):
    """Pick how many batch elements share one grid step.

    Preference order: fits (byte target + VMEM footprint) > grid has >=2 steps
    (pipelining + megacore split) > even grid length (balanced across v7x's two
    TensorCores) > bigger block (amortizes the ~0.35us per-step overhead).
    """
    HW = H * W
    per_batch = C * HW * itemsize
    best, best_key = None, None
    for d in range(1, N + 1):
        if N % d or (d * C) % sub_mult:
            continue
        grid = N // d
        fits = (d * per_batch <= max(target_bytes, per_batch)
                and _vmem_footprint_bytes(d, C, H, W, mid, itemsize) <= vmem_budget)
        key = (fits, grid >= 2, grid % 2 == 0, d)
        if best_key is None or key > best_key:
            best, best_key = d, key
    if best is None:
        raise ValueError(
            f"channel count {C} incompatible with the sublane tiling: need a "
            f"batch-block nb with (nb*C) % {sub_mult} == 0")
    return best


def ca_block(x, w1, wh, ww, *, block_batch=None, target_block_bytes=4 << 20):
    """CA_Block.forward: out = x * sigmoid(F_h(.)) * sigmoid(F_w(.))."""
    N, C, H, W = x.shape
    HW = H * W
    mid = w1.shape[0]
    itemsize = jnp.dtype(x.dtype).itemsize
    sub_mult = 8 * (4 // itemsize)        # 8 for f32, 16 for bf16, 32 for 8-bit
    assert HW % 128 == 0, "H*W must be a multiple of 128 for lane-dense streaming"
    assert C % 8 == 0, "channel count must be a multiple of 8"

    # Physical VMEM (64 MiB/core v7x, 128 MiB v5e/v6e) minus headroom.
    try:
        info = pltpu.get_tpu_info()
        vmem_cap = int(getattr(info, "vmem_capacity_bytes", 64 << 20))
    except Exception:
        vmem_cap = 64 << 20                # assume the smallest (v7x) if query fails
    vmem_budget = max(32 << 20, vmem_cap - (8 << 20))

    if block_batch is None:
        block_batch = _choose_block_batch(
            N, C, H, W, mid, itemsize, target_block_bytes, sub_mult, vmem_budget)
    nb = block_batch
    assert N % nb == 0 and (nb * C) % sub_mult == 0

    # Free metadata reshape: lane axis becomes H*W (lane-dense loads/stores).
    x2 = x.reshape(N * C, HW)

    # Block-diagonal 1x1-conv weights: one matmul handles all nb batch elements.
    eye_nb = jnp.eye(nb, dtype=jnp.float32)
    w1b = jnp.kron(eye_nb, w1.astype(jnp.float32))            # (nb*mid, nb*C)
    whb = jnp.kron(eye_nb, wh.astype(jnp.float32))            # (nb*C, nb*mid)
    wwb = jnp.kron(eye_nb, ww.astype(jnp.float32))            # (nb*C, nb*mid)

    # Constant pooling / expansion matrices, in the streaming dtype so the bf16
    # path stays bf16 end-to-end on the wide axis.
    eh = jnp.repeat(jnp.eye(H, dtype=jnp.float32), W, axis=1)  # (H, HW)
    ew = jnp.tile(jnp.eye(W, dtype=jnp.float32), (1, H))       # (W, HW)
    phw = jnp.concatenate([eh.T * (1.0 / W), ew.T * (1.0 / H)], axis=1)  # (HW, H+W)
    cd = x.dtype
    eh, ew, phw = eh.astype(cd), ew.astype(cd), phw.astype(cd)

    footprint = _vmem_footprint_bytes(nb, C, H, W, mid, itemsize)
    vmem_limit = int(min(vmem_budget, max(32 << 20, footprint)))

    cost = pl.CostEstimate(
        flops=int(2 * N * C * HW * (H + W)        # pooling matmul
                  + 4 * N * nb * mid * C * (H + W)  # block-diag 1x1-conv layers
                  + 2 * N * C * HW * (H + W)      # gate expansion matmuls
                  + 2 * N * C * HW),              # final rescale
        transcendentals=int(N * C * (H + W)),
        bytes_accessed=int(2 * N * C * HW * itemsize),
    )

    kernel = functools.partial(ca_block_kernel, H=H, W=W)

    out2 = pl.pallas_call(
        kernel,
        out_shape=jax.ShapeDtypeStruct((N * C, HW), x.dtype),
        grid_spec=pltpu.PrefetchScalarGridSpec(
            num_scalar_prefetch=0,
            grid=(N // nb,),
            in_specs=[
                pl.BlockSpec((nb * C, HW), lambda n: (n, 0)),
                pl.BlockSpec((nb * mid, nb * C), lambda n: (0, 0)),
                pl.BlockSpec((nb * C, nb * mid), lambda n: (0, 0)),
                pl.BlockSpec((nb * C, nb * mid), lambda n: (0, 0)),
                pl.BlockSpec((HW, H + W), lambda n: (0, 0)),
                pl.BlockSpec((H, HW), lambda n: (0, 0)),
                pl.BlockSpec((W, HW), lambda n: (0, 0)),
            ],
            out_specs=pl.BlockSpec((nb * C, HW), lambda n: (n, 0)),
        ),
        compiler_params=pltpu.CompilerParams(
            dimension_semantics=("parallel",),
            vmem_limit_bytes=vmem_limit,
        ),
        cost_estimate=cost,
    )(x2, w1b, whb, wwb, phw, eh, ew)

    return out2.reshape(N, C, H, W)


def ca_block_reference(x, w1, wh, ww):
    # Pure-JAX reference mirroring the PyTorch CA_Block.forward().
    x_h = jnp.mean(x, axis=3)                                        # (N, C, H)
    x_w = jnp.mean(x, axis=2)                                        # (N, C, W)
    y_h = jax.nn.relu(jnp.einsum('mc,nch->nmh', w1, x_h))
    y_w = jax.nn.relu(jnp.einsum('mc,ncw->nmw', w1, x_w))
    s_h = jax.nn.sigmoid(jnp.einsum('cm,nmh->nch', wh, y_h))         # (N, C, H)
    s_w = jax.nn.sigmoid(jnp.einsum('cm,nmw->ncw', ww, y_w))         # (N, C, W)
    return x * s_h[:, :, :, None] * s_w[:, :, None, :]


if __name__ == "__main__":
    # Small shapes consistent with the CA blocks of APnet_CA_3:
    # channel count a multiple of reduction=16, H*W a multiple of 128.
    N, C, H, W, reduction = 4, 32, 8, 32, 16
    mid = C // reduction

    key = jax.random.PRNGKey(0)
    kx, k1, k2, k3 = jax.random.split(key, 4)
    x = jax.random.normal(kx, (N, C, H, W), dtype=jnp.float32)
    w1 = jax.random.normal(k1, (mid, C), dtype=jnp.float32) * 0.1    # conv_1x1
    wh = jax.random.normal(k2, (C, mid), dtype=jnp.float32) * 0.1    # F_h
    ww = jax.random.normal(k3, (C, mid), dtype=jnp.float32) * 0.1    # F_w

    # f32 path
    out = jax.block_until_ready(ca_block(x, w1, wh, ww))
    ref = jax.block_until_ready(ca_block_reference(x, w1, wh, ww))
    assert out.shape == x.shape
    assert jnp.allclose(out, ref, rtol=5e-3, atol=5e-4), "f32 mismatch vs reference"

    # bf16 streaming path (memory-bound op -> ~2x fewer HBM bytes, bf16 gates).
    x_bf = x.astype(jnp.bfloat16)
    out_bf = jax.block_until_ready(ca_block(x_bf, w1, wh, ww))
    ref_bf = ca_block_reference(x_bf.astype(jnp.float32), w1, wh, ww)
    assert out_bf.dtype == jnp.bfloat16
    assert jnp.allclose(out_bf.astype(jnp.float32), ref_bf, rtol=5e-2, atol=5e-2), \
        "bf16 mismatch vs reference"

    print("KERNEL_OK")
</pallas_src>

<mosaic_0001>
module attributes {stable_mosaic.version = 11 : i64} {
  func.func @ca_block_kernel(%arg0: i32, %arg1: memref<64x256xf32, #tpu.memory_space<vmem>>, %arg2: memref<4x64xf32, #tpu.memory_space<vmem>>, %arg3: memref<64x4xf32, #tpu.memory_space<vmem>>, %arg4: memref<64x4xf32, #tpu.memory_space<vmem>>, %arg5: memref<256x40xf32, #tpu.memory_space<vmem>>, %arg6: memref<8x256xf32, #tpu.memory_space<vmem>>, %arg7: memref<32x256xf32, #tpu.memory_space<vmem>>, %arg8: memref<64x256xf32, #tpu.memory_space<vmem>>) attributes {dimension_semantics = [#tpu.dimension_semantics<parallel>], iteration_bounds = array<i64: 2>, scalar_prefetch = 0 : i64, scratch_operands = 0 : i64, tpu.core_type = #tpu.core_type<tc>, window_params = [{transform_indices = @transform_0, window_bounds = array<i64: 64, 256>}, {pipeline_mode = #tpu.pipeline_mode<synchronous>, transform_indices = @transform_1, window_bounds = array<i64: 4, 64>}, {pipeline_mode = #tpu.pipeline_mode<synchronous>, transform_indices = @transform_2, window_bounds = array<i64: 64, 4>}, {pipeline_mode = #tpu.pipeline_mode<synchronous>, transform_indices = @transform_3, window_bounds = array<i64: 64, 4>}, {pipeline_mode = #tpu.pipeline_mode<synchronous>, transform_indices = @transform_4, window_bounds = array<i64: 256, 40>}, {pipeline_mode = #tpu.pipeline_mode<synchronous>, transform_indices = @transform_5, window_bounds = array<i64: 8, 256>}, {pipeline_mode = #tpu.pipeline_mode<synchronous>, transform_indices = @transform_6, window_bounds = array<i64: 32, 256>}, {transform_indices = @transform_7, window_bounds = array<i64: 64, 256>}]} {
    %c0 = arith.constant 0 : index
    %c0_0 = arith.constant 0 : index
    %0 = vector.load %arg1[%c0, %c0_0] : memref<64x256xf32, #tpu.memory_space<vmem>>, vector<64x256xf32>
    %c0_1 = arith.constant 0 : index
    %c0_2 = arith.constant 0 : index
    %1 = vector.load %arg5[%c0_1, %c0_2] : memref<256x40xf32, #tpu.memory_space<vmem>>, vector<256x40xf32>
    %cst = arith.constant dense<0.000000e+00> : vector<64x40xf32>
    %2 = tpu.matmul %0, %1, %cst {dimension_numbers = #tpu.dot_dimension_numbers<[1], [0], [0], [1], [0, 0, 1, 1], [], []>} : vector<64x256xf32>, vector<256x40xf32>, vector<64x40xf32> -> vector<64x40xf32>
    %c0_3 = arith.constant 0 : index
    %c0_4 = arith.constant 0 : index
    %3 = vector.load %arg2[%c0_3, %c0_4] : memref<4x64xf32, #tpu.memory_space<vmem>>, vector<4x64xf32>
    %cst_5 = arith.constant dense<0.000000e+00> : vector<4x40xf32>
    %4 = tpu.matmul %3, %2, %cst_5 {dimension_numbers = #tpu.dot_dimension_numbers<[1], [0], [0], [1], [0, 0, 1, 1], [], []>} : vector<4x64xf32>, vector<64x40xf32>, vector<4x40xf32> -> vector<4x40xf32>
    %cst_6 = arith.constant 0.000000e+00 : f32
    %5 = vector.broadcast %cst_6 : f32 to vector<4x40xf32>
    %6 = arith.maximumf %4, %5 : vector<4x40xf32>
    %c0_7 = arith.constant 0 : index
    %c0_8 = arith.constant 0 : index
    %7 = vector.load %arg3[%c0_7, %c0_8] : memref<64x4xf32, #tpu.memory_space<vmem>>, vector<64x4xf32>
    %8 = vector.extract_strided_slice %6 {offsets = [0, 0], sizes = [4, 8], strides = [1, 1]} : vector<4x40xf32> to vector<4x8xf32>
    %cst_9 = arith.constant dense<0.000000e+00> : vector<64x8xf32>
    %9 = tpu.matmul %7, %8, %cst_9 {dimension_numbers = #tpu.dot_dimension_numbers<[1], [0], [0], [1], [0, 0, 1, 1], [], []>} : vector<64x4xf32>, vector<4x8xf32>, vector<64x8xf32> -> vector<64x8xf32>
    %10 = arith.negf %9 : vector<64x8xf32>
    %11 = math.exp %10 : vector<64x8xf32>
    %cst_10 = arith.constant 1.000000e+00 : f32
    %12 = vector.broadcast %cst_10 : f32 to vector<64x8xf32>
    %13 = arith.addf %12, %11 : vector<64x8xf32>
    %14 = arith.divf %12, %13 : vector<64x8xf32>
    %c0_11 = arith.constant 0 : index
    %c0_12 = arith.constant 0 : index
    %15 = vector.load %arg4[%c0_11, %c0_12] : memref<64x4xf32, #tpu.memory_space<vmem>>, vector<64x4xf32>
    %16 = vector.extract_strided_slice %6 {offsets = [0, 8], sizes = [4, 32], strides = [1, 1]} : vector<4x40xf32> to vector<4x32xf32>
    %cst_13 = arith.constant dense<0.000000e+00> : vector<64x32xf32>
    %17 = tpu.matmul %15, %16, %cst_13 {dimension_numbers = #tpu.dot_dimension_numbers<[1], [0], [0], [1], [0, 0, 1, 1], [], []>} : vector<64x4xf32>, vector<4x32xf32>, vector<64x32xf32> -> vector<64x32xf32>
    %18 = arith.negf %17 : vector<64x32xf32>
    %19 = math.exp %18 : vector<64x32xf32>
    %cst_14 = arith.constant 1.000000e+00 : f32
    %20 = vector.broadcast %cst_14 : f32 to vector<64x32xf32>
    %21 = arith.addf %20, %19 : vector<64x32xf32>
    %22 = arith.divf %20, %21 : vector<64x32xf32>
    %c0_15 = arith.constant 0 : index
    %c0_16 = arith.constant 0 : index
    %23 = vector.load %arg6[%c0_15, %c0_16] : memref<8x256xf32, #tpu.memory_space<vmem>>, vector<8x256xf32>
    %cst_17 = arith.constant dense<0.000000e+00> : vector<64x256xf32>
    %24 = tpu.matmul %14, %23, %cst_17 {dimension_numbers = #tpu.dot_dimension_numbers<[1], [0], [0], [1], [0, 0, 1, 1], [], []>} : vector<64x8xf32>, vector<8x256xf32>, vector<64x256xf32> -> vector<64x256xf32>
    %c0_18 = arith.constant 0 : index
    %c0_19 = arith.constant 0 : index
    %25 = vector.load %arg7[%c0_18, %c0_19] : memref<32x256xf32, #tpu.memory_space<vmem>>, vector<32x256xf32>
    %cst_20 = arith.constant dense<0.000000e+00> : vector<64x256xf32>
    %26 = tpu.matmul %22, %25, %cst_20 {dimension_numbers = #tpu.dot_dimension_numbers<[1], [0], [0], [1], [0, 0, 1, 1], [], []>} : vector<64x32xf32>, vector<32x256xf32>, vector<64x256xf32> -> vector<64x256xf32>
    %27 = arith.mulf %0, %24 : vector<64x256xf32>
    %28 = arith.mulf %27, %26 : vector<64x256xf32>
    %c0_21 = arith.constant 0 : index
    %c0_22 = arith.constant 0 : index
    %29 = vector.load %arg8[%c0_21, %c0_22] : memref<64x256xf32, #tpu.memory_space<vmem>>, vector<64x256xf32>
    tpu.vector_store %arg8[%c0_21, %c0_22], %28 {strides = array<i32>} : memref<64x256xf32, #tpu.memory_space<vmem>>, vector<64x256xf32>,
    return
  }
  func.func @transform_0(%arg0: i32) -> (i32, i32) {
    %c0_i32 = arith.constant 0 : i32
    %c0_i32_0 = arith.constant 0 : i32
    return %arg0, %c0_i32 : i32, i32
  }
  func.func @transform_1(%arg0: i32) -> (i32, i32) {
    %c0_i32 = arith.constant 0 : i32
    %c0_i32_0 = arith.constant 0 : i32
    %c0_i32_1 = arith.constant 0 : i32
    return %c0_i32, %c0_i32_0 : i32, i32
  }
  func.func @transform_2(%arg0: i32) -> (i32, i32) {
    %c0_i32 = arith.constant 0 : i32
    %c0_i32_0 = arith.constant 0 : i32
    %c0_i32_1 = arith.constant 0 : i32
    return %c0_i32, %c0_i32_0 : i32, i32
  }
  func.func @transform_3(%arg0: i32) -> (i32, i32) {
    %c0_i32 = arith.constant 0 : i32
    %c0_i32_0 = arith.constant 0 : i32
    %c0_i32_1 = arith.constant 0 : i32
    return %c0_i32, %c0_i32_0 : i32, i32
  }
  func.func @transform_4(%arg0: i32) -> (i32, i32) {
    %c0_i32 = arith.constant 0 : i32
    %c0_i32_0 = arith.constant 0 : i32
    %c0_i32_1 = arith.constant 0 : i32
    return %c0_i32, %c0_i32_0 : i32, i32
  }
  func.func @transform_5(%arg0: i32) -> (i32, i32) {
    %c0_i32 = arith.constant 0 : i32
    %c0_i32_0 = arith.constant 0 : i32
    %c0_i32_1 = arith.constant 0 : i32
    return %c0_i32, %c0_i32_0 : i32, i32
  }
  func.func @transform_6(%arg0: i32) -> (i32, i32) {
    %c0_i32 = arith.constant 0 : i32
    %c0_i32_0 = arith.constant 0 : i32
    %c0_i32_1 = arith.constant 0 : i32
    return %c0_i32, %c0_i32_0 : i32, i32
  }
  func.func @transform_7(%arg0: i32) -> (i32, i32) {
    %c0_i32 = arith.constant 0 : i32
    %c0_i32_0 = arith.constant 0 : i32
    return %arg0, %c0_i32 : i32, i32
  }
}

</mosaic_0001>

<bundles_post_ra>
// kernel: tpu_custom_call.1
= control target key start
LH: loop header
LB: loop body
LE: loop exit
PB: predicated region body
PF: predicated region fallthrough
CT: control target
= control target key end

     0   :  { %12 = vsyncpa [#allocation3], 0  ;;  %s2168_s0 = inlined_call_operand.vmem [shape: f32[128,256], index: 0, kind: input, shape index: {}]   ;;  %s2169_s1 = inlined_call_operand.vmem [shape: f32[4,64], index: 1, kind: input, shape index: {}]   ;;  %s2170_s2 = inlined_call_operand.vmem [shape: f32[64,4], index: 2, kind: input, shape index: {}]   ;;  %s2171_s3 = inlined_call_operand.vmem [shape: f32[64,4], index: 3, kind: input, shape index: {}]   ;;  %s2172_s4 = inlined_call_operand.vmem [shape: f32[256,40], index: 4, kind: input, shape index: {}]   ;;  %s2173_s5 = inlined_call_operand.vmem [shape: f32[8,256], index: 5, kind: input, shape index: {}]   ;;  %s2174_s6 = inlined_call_operand.vmem [shape: f32[32,256], index: 6, kind: input, shape index: {}]   ;;  %s2175_s7 = inlined_call_operand.hbm [shape: f32[128,256], index: 7, kind: output, shape index: {}]  }
   0x1   :  { %14 = vsyncpa [#allocation3 + $0x1], 0  ;;  %s1724_s24 = smov 0   ;;  %s1726_s25 = smov 0  }
   0x2   :  { %s1728_s26 = smov 0   ;;  %s1730_s27 = smov 0  }
   0x3 LB: > { %s1745_s28 = sadd.s32 4294967295, %s1676_s27   ;;  %s1302_s29 = sadd.s32 4294967294, %s1676_s27   ;;  %s1676_s27 = sphi %s1730_s27, %s2181_s27   ;;  %s1672_s26 = sphi %s1728_s26, %s2180_s26   ;;  %s1668_s25 = sphi %s1726_s25, %s2179_s25   ;;  %s1664_s24 = sphi %s1724_s24, %s2178_s24  }
   0x4   : > { %s1749_s30 = sadd.s32 1, %s1676_s27   ;;  %s179_s8 = sadd.s32 1, %s1672_s26 }
   0x5   : > { %s176_s9 = ssub.s32 %s1676_s27, %s1749_s30  ;;  %p189_p0 = scmp.ne.s32.totalorder %s1672_s26, %s1668_s25 }
   0x6   : > { %p177_p1 = scmp.eq.s32.totalorder %s176_s9, 0  ;;  %p190_p2 = scmp.eq.s32.totalorder %s1745_s28, 1 }
   0x7   : > { %p195_p3 = scmp.ne.s32.totalorder %s1668_s25, %s1664_s24  ;;  %p196_p4 = scmp.eq.s32.totalorder %s1302_s29, 1 }
   0x8   : > { %s1760_s10 = scalar_select %p177_p1, %s1672_s26, %s179_s8  }
   0x9   : > { %p1762_p5 = por %p190_p2, %p189_p0  ;;  %p1766_p6 = por %p196_p4, %p195_p3 }
   0xa   : > { %p1305_p7 = scmp.ge.s32.totalorder %s1676_s27, 1  ;;  %p242_p8 = scmp.lt.s32.totalorder %s1676_s27, 3 }
   0xc   : > { %p243_p9 = pnand %p1305_p7, %p242_p8 }
   0xd   : > { %s1307_s19 = sshll.u32 (!%p243_p9), %s1745_s28, 3  ;;  %s1680_s21 = smov (!%p243_p9), 120  }
   0xe   : > { %246 = sbr.rel (%p243_p9) target bundleno = 1066 (0x42a), region = 48  ;;  %p276_p10 = scmp.lt.s32.totalorder (!%p243_p9), %s1307_s19, 15 }
   0xf   : > { %s272_s14 = sand.u32 (!%p243_p9), 1, %s1668_s25   ;;  %s1681_s23 = smov (!%p243_p9), [#allocation2]  }
  0x10   : > { %s1620_s8 = sshll.u32 (!%p243_p9), %s1681_s23, 4  ;;  %s1621_s8 = int_to_ptr.vmem [resolvable:$false] %s1620_s8 }
  0x11   : > { %s1622_s9 = scalar_lea.vmem (!%p243_p9), %s1621_s8, 4096 }
  0x13   : > { %v330_v0 = vld [vmem:[%s2172_s4 + $0xf8] sm:$0xff]  ;;  %v329_v2 = vld [vmem:[%s2172_s4 + $0xf0] sm:$0xff]  ;;  %v328_v4 = vld [vmem:[%s2172_s4 + $0xe8] sm:$0xff]  ;;  %s2183_s19 = smov (!%p276_p10, %s1307_s19), 15  ;;  %v1678_v48 = vmov 0.0   ;;  %vm1679_vm0 = vmmov 0  }
  0x14   : > { %v314_v1 = vld [vmem:[%s2172_s4 + $0x78] sm:$0xff]  ;;  %1370 = vmatprep.subr.mxu0 %v330_v0  ;;  %v313_v3 = vld [vmem:[%s2172_s4 + $0x70] sm:$0xff]  ;;  %v312_v5 = vld [vmem:[%s2172_s4 + $0x68] sm:$0xff]  ;;  %s1367_s16 = sshll.u32 %s2183_s19, 4  ;;  %1453 = vmatprep.subr.mxu1 %v1678_v48  ;;  %vm437_vm1 = vcmask 523264   ;;  %vm520_vm2 = vcmask 31744  }
  0x15   : > { %1371 = vmatpush3.msra.mxu0 %v314_v1  ;;  %v327_v6 = vld [vmem:[%s2172_s4 + $0xe0] sm:$0xff]  ;;  %v326_v8 = vld [vmem:[%s2172_s4 + $0xd8] sm:$0xff]  ;;  %s1806_s29 = scalar_lea.vmem %s2168_s0, %s1367_s16  ;;  %v325_v10 = vld [vmem:[%s2172_s4 + $0xd0] sm:$0xff]  ;;  %1469 = vmatprep.mubr.msk.f32.mxu1 %vm1679_vm0, %v1678_v48  ;;  %vm545_vm3 = vcmask 1043456   ;;  %vm893_vm4 = vcmask 64512   ;;  %vm1039_vm5 = vcmask 261120  }
  0x16   : > { %1372 = vmatprep.subr.mxu0 %v329_v2  ;;  %v311_v7 = vld [vmem:[%s2172_s4 + $0x60] sm:$0xff]  ;;  %v310_v9 = vld [vmem:[%s2172_s4 + $0x58] sm:$0xff]  ;;  %v309_v11 = vld [vmem:[%s2172_s4 + $0x50] sm:$0xff]  ;;  %s1369_s16 = sshll.u32 %s1745_s28, 11  ;;  %s2128_s28 = scalar_lea.sflag [#allocation3], %s272_s14 }
  0x17   : > { %1373 = vmatpush3.msra.mxu0 %v313_v3  ;;  %v324_v12 = vld [vmem:[%s2172_s4 + $0xc8] sm:$0xff]  ;;  %v323_v15 = vld [vmem:[%s2172_s4 + $0xc0] sm:$0xff]  ;;  %v322_v17 = vld [vmem:[%s2172_s4 + $0xb8] sm:$0xff] }
  0x18   : > { %1374 = vmatprep.subr.mxu0 %v328_v4  ;;  %v1818_v13 = vld [vmem:[%s1806_s29 + $0x8] sm:$0xff]  ;;  %v307_v16 = vld [vmem:[%s2172_s4 + $0x40] sm:$0xff]  ;;  %v306_v18 = vld [vmem:[%s2172_s4 + $0x38] sm:$0xff] }
  0x19   : > { %1375 = vmatpush3.msra.mxu0 %v312_v5  ;;  %v308_v14 = vld [vmem:[%s2172_s4 + $0x48] sm:$0xff]  ;;  %395 = vmatprep.mubr.f32.mxu0 %v1818_v13  ;;  %v321_v19 = vld [vmem:[%s2172_s4 + $0xb0] sm:$0xff]  ;;  %v319_v23 = vld [vmem:[%s2172_s4 + $0xa0] sm:$0xff] }
  0x1a   : > { %1376 = vmatprep.subr.mxu0 %v327_v6  ;;  %v305_v20 = vld [vmem:[%s2172_s4 + $0x30] sm:$0xff]  ;;  %v320_v21 = vld [vmem:[%s2172_s4 + $0xa8] sm:$0xff]  ;;  %v303_v24 = vld [vmem:[%s2172_s4 + $0x20] sm:$0xff] }
  0x1b   : > { %1377 = vmatpush3.msra.mxu0 %v311_v7  ;;  %v304_v22 = vld [vmem:[%s2172_s4 + $0x28] sm:$0xff]  ;;  %v318_v25 = vld [vmem:[%s2172_s4 + $0x98] sm:$0xff]  ;;  %v317_v27 = vld [vmem:[%s2172_s4 + $0x90] sm:$0xff] }
  0x1c   : > { %1378 = vmatprep.subr.mxu0 %v326_v8  ;;  %v302_v26 = vld [vmem:[%s2172_s4 + $0x18] sm:$0xff]  ;;  %v301_v28 = vld [vmem:[%s2172_s4 + $0x10] sm:$0xff]  ;;  %v316_v29 = vld [vmem:[%s2172_s4 + $0x88] sm:$0xff] }
  0x1d   : > { %1379 = vmatpush3.msra.mxu0 %v310_v9  ;;  %v300_v30 = vld [vmem:[%s2172_s4 + $0x8] sm:$0xff]  ;;  %v315_v31 = vld [vmem:[%s2172_s4 + $0x80] sm:$0xff]  ;;  %v1882_v34 = vld [vmem:[%s1806_s29 + $0x18] sm:$0xff] }
  0x1e   : > { %1380 = vmatprep.subr.mxu0 %v325_v10  ;;  %v299_v32 = vld [vmem:[%s2172_s4] sm:$0xff]  ;;  %v1887_v35 = vld [vmem:[%s1806_s29 + $0x10] sm:$0xff]  ;;  %v1890_v36 = vld [vmem:[%s1806_s29 + $0x28] sm:$0xff] }
  0x1f   : > { %1381 = vmatpush3.msra.mxu0 %v309_v11  ;;  %v1879_v33 = vld [vmem:[%s1806_s29] sm:$0xff]  ;;  %v1898_v38 = vld [vmem:[%s1806_s29 + $0x38] sm:$0xff]  ;;  %v1903_v39 = vld [vmem:[%s1806_s29 + $0x30] sm:$0xff] }
  0x20   : > { %1382 = vmatprep.subr.mxu0 %v324_v12  ;;  %v1895_v37 = vld [vmem:[%s1806_s29 + $0x20] sm:$0xff]  ;;  %v1906_v40 = vld [vmem:[%s1806_s29 + $0x48] sm:$0xff]  ;;  %v1914_v42 = vld [vmem:[%s1806_s29 + $0x58] sm:$0xff] }
  0x21   : > { %1383 = vmatpush3.msra.mxu0 %v308_v14  ;;  %v1911_v41 = vld [vmem:[%s1806_s29 + $0x40] sm:$0xff]  ;;  %v1919_v43 = vld [vmem:[%s1806_s29 + $0x50] sm:$0xff]  ;;  %v1922_v44 = vld [vmem:[%s1806_s29 + $0x68] sm:$0xff] }
  0x22   : > { %1384 = vmatprep.subr.mxu0 %v323_v15  ;;  %v1927_v45 = vld [vmem:[%s1806_s29 + $0x60] sm:$0xff]  ;;  %v1930_v46 = vld [vmem:[%s1806_s29 + $0x78] sm:$0xff]  ;;  %v1935_v47 = vld [vmem:[%s1806_s29 + $0x70] sm:$0xff]  ;;  %s1306_s29 = sshll.u32 %s272_s14, 7 }
  0x23   : > { %1385 = vmatpush3.msra.mxu0 %v307_v16  ;;  %v436_v9 = vld [vmem:[%s2169_s1] sm:$0xf]  ;;  %v513_v15 = vld [vmem:[%s2170_s2 + $0x8] sm:$0xff]  ;;  %v514_v16 = vld [vmem:[%s2170_s2 + $0x10] sm:$0xff]  ;;  %s2086_s15 = scalar_lea.vmem [#allocation2], %s1306_s29 }
  0x24   : > { %1386 = vmatprep.subr.mxu0 %v322_v17  ;;  %v512_v10 = vld [vmem:[%s2170_s2] sm:$0xff]  ;;  %v515_v17 = vld [vmem:[%s2170_s2 + $0x18] sm:$0xff]  ;;  %s1240_s17 = sshll.u32 %s2086_s15, 4  ;;  %s2122_s17 = int_to_ptr.vmem [resolvable:$true] %s1240_s17 }
  0x25   : > { %1387 = vmatpush3.msra.mxu0 %v306_v18  ;;  %v516_v18 = vld [vmem:[%s2170_s2 + $0x20] sm:$0xff]  ;;  %s1616_s22 = scalar_lea.vmem %s2122_s17, 2048  ;;  %p1623_p0 = scmp.lt.s32.totalorder %s2122_s17, %s1621_s8 }
  0x26   : > { %1388 = vmatprep.subr.mxu0 %v321_v19  ;;  %v517_v19 = vld [vmem:[%s2170_s2 + $0x28] sm:$0xff]  ;;  %p1617_p11 = scmp.ne.s32.totalorder %s2122_s17, %s1616_s22  ;;  %p1624_p1 = scmp.lt.s32.totalorder %s1622_s9, %s1616_s22 }
  0x27   : > { %1389 = vmatpush3.msra.mxu0 %v305_v20  ;;  %v518_v20 = vld [vmem:[%s2170_s2 + $0x30] sm:$0xff] }
  0x28   : > { %1390 = vmatprep.subr.mxu0 %v320_v21  ;;  %v519_v21 = vld [vmem:[%s2170_s2 + $0x38] sm:$0xff]  ;;  %p1618_p12 = pnand %p1617_p11, %p1762_p5  ;;  %p1625_p2 = por %p1624_p1, %p1623_p0 }
  0x29   : > { %1391 = vmatpush3.msra.mxu0 %v304_v22  ;;  %v702_v22 = vld [vmem:[%s2171_s3] sm:$0xff] }
  0x2a   : > { %1392 = vmatprep.subr.mxu0 %v319_v23  ;;  %p1619_p13 = pneg %p1618_p12 }
  0x2b   : > { %1393 = vmatpush3.msra.mxu0 %v303_v24  ;;  %v703_v24 = vld [vmem:[%s2171_s3 + $0x8] sm:$0xff] }
  0x2c   : > { %1394 = vmatprep.subr.mxu0 %v318_v25  ;;  %v704_v25 = vld [vmem:[%s2171_s3 + $0x10] sm:$0xff]  ;;  %p1626_p3 = pnand %p1625_p2, %p1619_p13 }
  0x2d   : > { %1395 = vmatpush3.msra.mxu0 %v302_v26  ;;  %v705_v26 = vld [vmem:[%s2171_s3 + $0x18] sm:$0xff] }
  0x2e   : > { %1396 = vmatprep.subr.mxu0 %v317_v27  ;;  %v706_v27 = vld [vmem:[%s2171_s3 + $0x20] sm:$0xff] }
  0x2f   : > { %1397 = vmatpush3.msra.mxu0 %v301_v28  ;;  %v707_v28 = vld [vmem:[%s2171_s3 + $0x28] sm:$0xff] }
  0x30   : > { %1398 = vmatprep.subr.mxu0 %v316_v29  ;;  %v708_v29 = vld [vmem:[%s2171_s3 + $0x30] sm:$0xff] }
  0x31   : > { %1399 = vmatpush3.msra.mxu0 %v300_v30  ;;  %v709_v30 = vld [vmem:[%s2171_s3 + $0x38] sm:$0xff] }
  0x32   : > { %1400 = vmatprep.subr.mxu0 %v315_v31  ;;  %v892_v31 = vld [vmem:[%s2173_s5 + $0x8] sm:$0xff] }
  0x33   : > { %1401 = vmatpush3.msra.mxu0 %v299_v32  ;;  %v891_v32 = vld [vmem:[%s2173_s5] sm:$0xff] }
  0x34   : > { %396 = vmatmul.mubr.f32.vlgmr.msra.gmra.mxu0 %v1879_v33 }
  0x35   : > { %400 = vmatprep.mubr.f32.mxu0 %v1882_v34 }
  0x38   : > { %401 = vmatmul.mubr.f32.gmra.mxu0 %v1887_v35 }
  0x39   : > { %405 = vmatprep.mubr.f32.mxu0 %v1890_v36 }
  0x3c   : > { %406 = vmatmul.mubr.f32.gmra.mxu0 %v1895_v37 }
  0x3d   : > { %410 = vmatprep.mubr.f32.mxu0 %v1898_v38 }
  0x40   : > { %411 = vmatmul.mubr.f32.gmra.mxu0 %v1903_v39 }
  0x41   : > { %415 = vmatprep.mubr.f32.mxu0 %v1906_v40 }
  0x44   : > { %416 = vmatmul.mubr.f32.gmra.mxu0 %v1911_v41 }
  0x45   : > { %420 = vmatprep.mubr.f32.mxu0 %v1914_v42 }
  0x48   : > { %421 = vmatmul.mubr.f32.gmra.mxu0 %v1919_v43 }
  0x49   : > { %425 = vmatprep.mubr.f32.mxu0 %v1922_v44 }
  0x4c   : > { %426 = vmatmul.mubr.f32.gmra.mxu0 %v1927_v45 }
  0x4d   : > { %430 = vmatprep.mubr.f32.mxu0 %v1930_v46 }
  0x50   : > { %431 = vmatmul.mubr.f32.gmra.mxu0 %v1935_v47 }
  0x51   : > { %1128 = vmatprep.mubr.f32.mxu0 %v1678_v48 }
  0xf4   : > { %v1402_v49 = vpop.f32.mrf.mxu0 }
  0xf6   : > { %v1403_v50 = vpop.f32.mrf.mxu0 }
  0xf7   : > { %v1404_v8 = vadd.f32 %v1403_v50, %v1402_v49 }
  0xf8   : > { %v1405_v51 = vpop.f32.mrf.mxu0 }
  0xfa   : > { %v1406_v52 = vpop.f32.mrf.mxu0 }
  0xfb   : > { %v1407_v7 = vadd.f32 %v1406_v52, %v1405_v51 }
  0xfc   : > { %v1408_v53 = vpop.f32.mrf.mxu0 }
  0xfe   : > { %v1409_v54 = vpop.f32.mrf.mxu0 }
  0xff   : > { %v1410_v6 = vadd.f32 %v1409_v54, %v1408_v53 }
 0x100   : > { %v1411_v55 = vpop.f32.mrf.mxu0 }
 0x102   : > { %v1412_v56 = vpop.f32.mrf.mxu0 }
 0x103   : > { %v1413_v5 = vadd.f32 %v1412_v56, %v1411_v55 }
 0x104   : > { %v1414_v57 = vpop.f32.mrf.mxu0 }
 0x106   : > { %v1415_v58 = vpop.f32.mrf.mxu0 }
 0x107   : > { %v1416_v4 = vadd.f32 %v1415_v58, %v1414_v57 }
 0x108   : > { %v1417_v59 = vpop.f32.mrf.mxu0 }
 0x10a   : > { %v1418_v60 = vpop.f32.mrf.mxu0 }
 0x10b   : > { %v1419_v3 = vadd.f32 %v1418_v60, %v1417_v59 }
 0x10c   : > { %v1420_v61 = vpop.f32.mrf.mxu0 }
 0x10e   : > { %v1421_v62 = vpop.f32.mrf.mxu0 }
 0x10f   : > { %v1422_v2 = vadd.f32 %v1421_v62, %v1420_v61  ;;  %v1038_v61 = vld [vmem:[%s2174_s6 + $0x38] sm:$0xff]  ;;  %v1037_v62 = vld [vmem:[%s2174_s6 + $0x30] sm:$0xff] }
 0x110   : > { %v1423_v63 = vpop.f32.mrf.mxu0  ;;  %1088 = vmatprep.subr.mxu0 %v1038_v61 }
 0x111   : > { %1089 = vmatpush1.msra.mxu0 %v1037_v62 }
 0x112   : > { %v1424_v0 = vpop.f32.mrf.mxu0 }
 0x113   : > { %v1425_v1 = vadd.f32 %v1424_v0, %v1423_v63 }
 0x115   : > { %1454 = vmatpush3.msra.mxu1 %v1425_v1  ;;  %v1036_v1 = vld [vmem:[%s2174_s6 + $0x28] sm:$0xff] }
 0x116   : > { %1455 = vmatprep.subr.mxu1 %v1678_v48  ;;  %1090 = vmatprep.subr.mxu0 %v1036_v1 }
 0x117   : > { %1456 = vmatpush3.msra.mxu1 %v1422_v2 }
 0x118   : > { %1457 = vmatprep.subr.mxu1 %v1678_v48 }
 0x119   : > { %1458 = vmatpush3.msra.mxu1 %v1419_v3  ;;  %v1035_v3 = vld [vmem:[%s2174_s6 + $0x20] sm:$0xff] }
 0x11a   : > { %1459 = vmatprep.subr.mxu1 %v1678_v48  ;;  %1091 = vmatpush1.msra.mxu0 %v1035_v3 }
 0x11b   : > { %1460 = vmatpush3.msra.mxu1 %v1416_v4  ;;  %v1034_v4 = vld [vmem:[%s2174_s6 + $0x18] sm:$0xff] }
 0x11c   : > { %1461 = vmatprep.subr.mxu1 %v1678_v48  ;;  %1092 = vmatprep.subr.mxu0 %v1034_v4 }
 0x11d   : > { %1462 = vmatpush3.msra.mxu1 %v1413_v5 }
 0x11e   : > { %1463 = vmatprep.subr.mxu1 %v1678_v48 }
 0x11f   : > { %1464 = vmatpush3.msra.mxu1 %v1410_v6 }
 0x120   : > { %1465 = vmatprep.subr.mxu1 %v1678_v48 }
 0x121   : > { %1466 = vmatpush3.msra.mxu1 %v1407_v7  ;;  %v1033_v7 = vld [vmem:[%s2174_s6 + $0x10] sm:$0xff] }
 0x122   : > { %1467 = vmatprep.subr.mxu1 %v1678_v48  ;;  %1093 = vmatpush1.msra.mxu0 %v1033_v7 }
 0x123   : > { %1468 = vmatpush3.msra.mxu1 %v1404_v8 }
 0x124   : > { %1470 = vmatmul.mubr.msk.f32.vlgmr.msra.gmra.mxu1 %vm437_vm1, %v436_v9 }
 0x125   : > { %1474 = vmatprep.mubr.msk.f32.mxu1 %vm520_vm2, %v512_v10  ;;  %v1032_v10 = vld [vmem:[%s2174_s6 + $0x8] sm:$0xff] }
 0x126   : > { %1094 = vmatprep.subr.mxu0 %v1032_v10 }
 0x1e4   : > { %v507_v11 = vpop.f32.mrf.mxu1 }
 0x1e5   : > { %v511_v12 = vmax.f32 %v507_v11, 0.0  ;;  %v1031_v11 = vld [vmem:[%s2174_s6] sm:$0xff] }
 0x1e6   : > { %v1471_v14 = vpop.f32.mrf.mxu1  ;;  %1095 = vmatpush1.msra.mxu0 %v1031_v11 }
 0x1e7   : > { %1472 = vmatprep.subr.msk.mxu1 %vm545_vm3, %v511_v12  ;;  %710 = vrot.lane.b32.xlu0 %v511_v12, %s1680_s21  ;;  %s2120_s21 = scalar_lea.hbm %s2175_s7, %s1369_s16 }
 0x1e8   : > { %1473 = vmatpush3.msk.msra.mxu1 %vm545_vm3, %v511_v12 }
 0x1e9   : > { %1475 = vmatmul.mubr.msk.f32.vlgmr.msra.gmra.mxu1 %vm520_vm2, %v513_v15 }
 0x1ea   : > { %1477 = vmatprep.mubr.msk.f32.mxu1 %vm520_vm2, %v514_v16 }
 0x1ed   : > { %1478 = vmatmul.mubr.msk.f32.gmra.mxu1 %vm520_vm2, %v515_v17 }
 0x1ee   : > { %1480 = vmatprep.mubr.msk.f32.mxu1 %vm520_vm2, %v516_v18 }
 0x1f1   : > { %1481 = vmatmul.mubr.msk.f32.gmra.mxu1 %vm520_vm2, %v517_v19 }
 0x1f2   : > { %1483 = vmatprep.mubr.msk.f32.mxu1 %vm520_vm2, %v518_v20 }
 0x1f5   : > { %1484 = vmatmul.mubr.msk.f32.gmra.mxu1 %vm520_vm2, %v519_v21 }
 0x1f6   : > { %1488 = vmatprep.mubr.msk.f32.mxu1 %vm520_vm2, %v702_v22 }
 0x259   : > { %v711_v23 = vpop.permute.xlu0 %710 }
 0x25a   : > { %1486 = vmatprep.subr.msk.mxu1 %vm545_vm3, %v711_v23 }
 0x25b   : > { %1487 = vmatpush3.msk.msra.mxu1 %vm545_vm3, %v711_v23 }
 0x25c   : > { %1489 = vmatmul.mubr.msk.f32.vlgmr.msra.gmra.mxu1 %vm520_vm2, %v703_v24  ;;  %948 = vmatprep.subr.mxu1 %v892_v31 }
 0x25d   : > { %1491 = vmatprep.mubr.msk.f32.mxu1 %vm520_vm2, %v704_v25  ;;  %949 = vmatpush1.msra.mxu1 %v891_v32 }
 0x25e   : > { %1500 = vmatprep.subr.mxu1 %v1038_v61 }
 0x260   : > { %1492 = vmatmul.mubr.msk.f32.gmra.mxu1 %vm520_vm2, %v705_v26 }
 0x261   : > { %1494 = vmatprep.mubr.msk.f32.mxu1 %vm520_vm2, %v706_v27 }
 0x264   : > { %1495 = vmatmul.mubr.msk.f32.gmra.mxu1 %vm520_vm2, %v707_v28 }
 0x265   : > { %1497 = vmatprep.mubr.msk.f32.mxu1 %vm520_vm2, %v708_v29 }
 0x268   : > { %1498 = vmatmul.mubr.msk.f32.gmra.mxu1 %vm520_vm2, %v709_v30 }
 0x269   : > { %982 = vmatprep.mubr.f32.mxu1 %v1678_v48 }
 0x2a9   : > { %v1476_v49 = vpop.f32.mrf.mxu1 }
 0x2aa   : > { %v1321_v50 = vmul.f32 -1.442695, %v1476_v49 }
 0x2ab   : > { %v615_v51 = vpop.f32.mrf.mxu1 }
 0x2ac   : > { %1552 = vpow2.f32 %v1321_v50  ;;  %v1320_v52 = vmul.f32 -1.442695, %v615_v51 }
 0x2ad   : > { %v1479_v53 = vpop.f32.mrf.mxu1 }
 0x2ae   : > { %1554 = vpow2.f32 %v1320_v52  ;;  %v1323_v55 = vmul.f32 -1.442695, %v1479_v53 }
 0x2af   : > { %v625_v54 = vpop.f32.mrf.mxu1 }
 0x2b0   : > { %v1322_v56 = vmul.f32 -1.442695, %v625_v54 }
 0x2b1   : > { %v1482_v57 = vpop.f32.mrf.mxu1 }
 0x2b2   : > { %1556 = vpow2.f32 %v1322_v56  ;;  %v1325_v63 = vmul.f32 -1.442695, %v1482_v57 }
 0x2b3   : > { %v635_v58 = vpop.f32.mrf.mxu1  ;;  %1558 = vpow2.f32 %v1323_v55 }
 0x2b4   : > { %v1324_v59 = vmul.f32 -1.442695, %v635_v58 }
 0x2b5   : > { %v1485_v60 = vpop.f32.mrf.mxu1 }
 0x2b6   : > { %1560 = vpow2.f32 %v1324_v59  ;;  %v1327_v14 = vmul.f32 -1.442695, %v1485_v60 }
 0x2b7   : > { %v645_v0 = vpop.f32.mrf.mxu1  ;;  %1562 = vpow2.f32 %v1325_v63 }
 0x2b8   : > { %v1326_v6 = vmul.f32 -1.442695, %v645_v0 }
 0x2b9   : > { %v1553_v2 = vpop.eup %1552 }
 0x2ba   : > { %v679_v8 = vadd.f32 1.0, %v1553_v2 }
 0x2bb   : > { %v1555_v5 = vpop.eup %1554 }
 0x2bc   : > { %v678_v9 = vadd.f32 1.0, %v1555_v5 }
 0x2be   : > { %1564 = vrcp.f32 %v678_v9 }
 0x2bf   : > { %v1557_v12 = vpop.eup %1556  ;;  %1566 = vpow2.f32 %v1326_v6 }
 0x2c0   : > { %1568 = vrcp.f32 %v679_v8  ;;  %v680_v15 = vadd.f32 1.0, %v1557_v12  ;;  %v1559_v16 = vpop.eup %1558 }
 0x2c1   : > { %1570 = vpow2.f32 %v1327_v14  ;;  %v681_v17 = vadd.f32 1.0, %v1559_v16 }
 0x2c2   : > { %1572 = vrcp.f32 %v680_v15 }
 0x2c3   : > { %v1561_v18 = vpop.eup %1560  ;;  %1574 = vrcp.f32 %v681_v17 }
 0x2c4   : > { %v682_v19 = vadd.f32 1.0, %v1561_v18  ;;  %v1563_v20 = vpop.eup %1562 }
 0x2c5   : > { %v683_v23 = vadd.f32 1.0, %v1563_v20 }
 0x2c6   : > { %1576 = vrcp.f32 %v682_v19 }
 0x2c7   : > { %1578 = vrcp.f32 %v683_v23 }
 0x2cb   : > { %v1565_v21 = vpop.eup %1564 }
 0x2cc   : > { %v1567_v22 = vpop.eup %1566  ;;  %1345 = vmatmul.mubr.msk.f32.vlgmr.msra.gmra.mxu1 %vm893_vm4, %v1565_v21 }
 0x2cd   : > { %v1569_v24 = vpop.eup %1568  ;;  %988 = vmatprep.mubr.f32.mxu1 %v1678_v48  ;;  %1504 = vmatpush1.msra.mxu1 %v1037_v62  ;;  %v684_v26 = vadd.f32 1.0, %v1567_v22 }
 0x2ce   : > { %1501 = vmatprep.subr.mxu1 %v1036_v1  ;;  %v1571_v25 = vpop.eup %1570 }
 0x2cf   : > { %1505 = vmatpush1.msra.mxu1 %v1035_v3  ;;  %v1573_v27 = vpop.eup %1572  ;;  %v685_v28 = vadd.f32 1.0, %v1571_v25  ;;  %1580 = vrcp.f32 %v684_v26 }
 0x2d0   : > { %1346 = vmatmul.mubr.msk.f32.gmra.mxu1 %vm893_vm4, %v1569_v24  ;;  %1502 = vmatprep.subr.mxu1 %v1034_v4  ;;  %v1575_v29 = vpop.eup %1574 }
 0x2d1   : > { %994 = vmatprep.mubr.f32.mxu1 %v1678_v48  ;;  %1506 = vmatpush1.msra.mxu1 %v1033_v7  ;;  %1582 = vrcp.f32 %v685_v28 }
 0x2d2   : > { %1503 = vmatprep.subr.mxu1 %v1032_v10 }
 0x2d3   : > { %1507 = vmatpush1.msra.mxu1 %v1031_v11  ;;  %v1577_v30 = vpop.eup %1576 }
 0x2d4   : > { %1347 = vmatmul.mubr.msk.f32.gmra.mxu1 %vm893_vm4, %v1573_v27  ;;  %v1579_v31 = vpop.eup %1578 }
 0x2d5   : > { %1000 = vmatprep.mubr.f32.mxu1 %v1678_v48 }
 0x2d8   : > { %1348 = vmatmul.mubr.msk.f32.gmra.mxu1 %vm893_vm4, %v1575_v29 }
 0x2d9   : > { %1006 = vmatprep.mubr.f32.mxu1 %v1678_v48 }
 0x2dc   : > { %1349 = vmatmul.mubr.msk.f32.gmra.mxu1 %vm893_vm4, %v1577_v30  ;;  %v1581_v32 = vpop.eup %1580 }
 0x2dd   : > { %1012 = vmatprep.mubr.f32.mxu1 %v1678_v48 }
 0x2de   : > { %v1583_v49 = vpop.eup %1582 }
 0x2e0   : > { %1350 = vmatmul.mubr.msk.f32.gmra.mxu1 %vm893_vm4, %v1579_v31 }
 0x2e1   : > { %1018 = vmatprep.mubr.f32.mxu1 %v1678_v48 }
 0x2e4   : > { %1351 = vmatmul.mubr.msk.f32.gmra.mxu1 %vm893_vm4, %v1581_v32 }
 0x2e5   : > { %1024 = vmatprep.mubr.f32.mxu1 %v1678_v48 }
 0x2e8   : > { %1352 = vmatmul.mubr.msk.f32.gmra.mxu1 %vm893_vm4, %v1583_v49 }
 0x2e9   : > { %1170 = vmatprep.mubr.f32.mxu1 %v1678_v48 }
 0x31c   : > { %v1490_v50 = vpop.f32.mrf.mxu1 }
 0x31d   : > { %v1338_v51 = vmul.f32 -1.442695, %v1490_v50 }
 0x31e   : > { %v804_v52 = vpop.f32.mrf.mxu1 }
 0x31f   : > { %v1337_v53 = vmul.f32 -1.442695, %v804_v52  ;;  %1584 = vpow2.f32 %v1338_v51 }
 0x320   : > { %v1493_v54 = vpop.f32.mrf.mxu1 }
 0x321   : > { %1586 = vpow2.f32 %v1337_v53  ;;  %v1340_v58 = vmul.f32 -1.442695, %v1493_v54 }
 0x322   : > { %v814_v55 = vpop.f32.mrf.mxu1 }
 0x323   : > { %v1339_v56 = vmul.f32 -1.442695, %v814_v55 }
 0x324   : > { %v1496_v57 = vpop.f32.mrf.mxu1 }
 0x325   : > { %1588 = vpow2.f32 %v1339_v56  ;;  %v1342_v63 = vmul.f32 -1.442695, %v1496_v57 }
 0x326   : > { %v824_v59 = vpop.f32.mrf.mxu1  ;;  %1590 = vpow2.f32 %v1340_v58 }
 0x327   : > { %v1341_v61 = vmul.f32 -1.442695, %v824_v59 }
 0x328   : > { %v1499_v60 = vpop.f32.mrf.mxu1 }
 0x329   : > { %v1344_v62 = vmul.f32 -1.442695, %v1499_v60 }
 0x32a   : > { %v834_v1 = vpop.f32.mrf.mxu1 }
 0x32b   : > { %1592 = vpow2.f32 %v1344_v62  ;;  %v1343_v4 = vmul.f32 -1.442695, %v834_v1 }
 0x32c   : > { %v1585_v0 = vpop.eup %1584  ;;  %1594 = vpow2.f32 %v1341_v61 }
 0x32d   : > { %1596 = vpow2.f32 %v1342_v63  ;;  %v868_v5 = vadd.f32 1.0, %v1585_v0 }
 0x32e   : > { %v1587_v2 = vpop.eup %1586 }
 0x32f   : > { %v867_v3 = vadd.f32 1.0, %v1587_v2 }
 0x331   : > { %1598 = vrcp.f32 %v867_v3 }
 0x332   : > { %v1589_v6 = vpop.eup %1588  ;;  %1600 = vpow2.f32 %v1343_v4 }
 0x333   : > { %1602 = vrcp.f32 %v868_v5  ;;  %v869_v7 = vadd.f32 1.0, %v1589_v6  ;;  %v1591_v8 = vpop.eup %1590 }
 0x334   : > { %v870_v10 = vadd.f32 1.0, %v1591_v8 }
 0x335   : > { %1604 = vrcp.f32 %v869_v7 }
 0x338   : > { %v1593_v9 = vpop.eup %1592 }
 0x339   : > { %v874_v11 = vadd.f32 1.0, %v1593_v9  ;;  %v1595_v12 = vpop.eup %1594 }
 0x33a   : > { %v1597_v14 = vpop.eup %1596  ;;  %v871_v15 = vadd.f32 1.0, %v1595_v12 }
 0x33b   : > { %1606 = vrcp.f32 %v874_v11  ;;  %v872_v18 = vadd.f32 1.0, %v1597_v14 }
 0x33c   : > { %1608 = vrcp.f32 %v870_v10 }
 0x33d   : > { %1610 = vrcp.f32 %v871_v15 }
 0x33e   : > { %v1599_v16 = vpop.eup %1598  ;;  %1612 = vrcp.f32 %v872_v18 }
 0x33f   : > { %1353 = vmatmul.mubr.msk.f32.vlgmr.msra.gmra.mxu0 %vm1039_vm5, %v1599_v16  ;;  %v1601_v17 = vpop.eup %1600 }
 0x340   : > { %1134 = vmatprep.mubr.f32.mxu0 %v1678_v48  ;;  %v1603_v19 = vpop.eup %1602  ;;  %v873_v20 = vadd.f32 1.0, %v1601_v17 }
 0x342   : > { %v1605_v21 = vpop.eup %1604  ;;  %1614 = vrcp.f32 %v873_v20 }
 0x343   : > { %1354 = vmatmul.mubr.msk.f32.gmra.mxu0 %vm1039_vm5, %v1603_v19 }
 0x344   : > { %1140 = vmatprep.mubr.f32.mxu0 %v1678_v48 }
 0x347   : > { %1355 = vmatmul.mubr.msk.f32.gmra.mxu0 %vm1039_vm5, %v1605_v21 }
 0x348   : > { %v1607_v22 = vpop.eup %1606  ;;  %1146 = vmatprep.mubr.f32.mxu0 %v1678_v48 }
 0x349   : > { %1360 = vmatmul.mubr.msk.f32.vlgmr.msra.gmra.mxu1 %vm1039_vm5, %v1607_v22  ;;  %v1609_v23 = vpop.eup %1608 }
 0x34a   : > { %v1611_v24 = vpop.eup %1610 }
 0x34b   : > { %1356 = vmatmul.mubr.msk.f32.gmra.mxu0 %vm1039_vm5, %v1609_v23  ;;  %v1613_v25 = vpop.eup %1612 }
 0x34c   : > { %1152 = vmatprep.mubr.f32.mxu0 %v1678_v48 }
 0x34f   : > { %1357 = vmatmul.mubr.msk.f32.gmra.mxu0 %vm1039_vm5, %v1611_v24  ;;  %v1615_v26 = vpop.eup %1614 }
 0x350   : > { %1158 = vmatprep.mubr.f32.mxu0 %v1678_v48 }
 0x353   : > { %1358 = vmatmul.mubr.msk.f32.gmra.mxu0 %vm1039_vm5, %v1613_v25 }
 0x354   : > { %1164 = vmatprep.mubr.f32.mxu0 %v1678_v48 }
 0x357   : > { %1359 = vmatmul.mubr.msk.f32.gmra.mxu0 %vm1039_vm5, %v1615_v26 }
 0x38c   : > { %v984_v27 = vpop.f32.mrf.mxu1 }
 0x38d   : > { %v1177_v48 = vmul.f32 %v984_v27, %v1879_v33 }
 0x38e   : > { %v986_v28 = vpop.f32.mrf.mxu1 }
 0x38f   : > { %v1178_v58 = vmul.f32 %v986_v28, %v1818_v13 }
 0x390   : > { %v990_v29 = vpop.f32.mrf.mxu1 }
 0x391   : > { %v1179_v61 = vmul.f32 %v990_v29, %v1887_v35 }
 0x392   : > { %v992_v30 = vpop.f32.mrf.mxu1 }
 0x393   : > { %v1180_v33 = vmul.f32 %v992_v30, %v1882_v34 }
 0x394   : > { %v996_v31 = vpop.f32.mrf.mxu1 }
 0x395   : > { %v1181_v2 = vmul.f32 %v996_v31, %v1895_v37 }
 0x396   : > { %v998_v32 = vpop.f32.mrf.mxu1 }
 0x397   : > { %v1182_v5 = vmul.f32 %v998_v32, %v1890_v36 }
 0x398   : > { %v1002_v49 = vpop.f32.mrf.mxu1 }
 0x399   : > { %v1183_v9 = vmul.f32 %v1002_v49, %v1903_v39 }
 0x39a   : > { %v1004_v50 = vpop.f32.mrf.mxu1 }
 0x39b   : > { %v1184_v36 = vmul.f32 %v1004_v50, %v1898_v38 }
 0x39c   : > { %v1008_v51 = vpop.f32.mrf.mxu1 }
 0x39d   : > { %v1185_v17 = vmul.f32 %v1008_v51, %v1911_v41 }
 0x39e   : > { %v1010_v52 = vpop.f32.mrf.mxu1 }
 0x39f   : > { %v1186_v18 = vmul.f32 %v1010_v52, %v1906_v40 }
 0x3a0   : > { %v1014_v53 = vpop.f32.mrf.mxu1 }
 0x3a1   : > { %v1187_v20 = vmul.f32 %v1014_v53, %v1919_v43 }
 0x3a2   : > { %v1016_v54 = vpop.f32.mrf.mxu1 }
 0x3a3   : > { %v1188_v41 = vmul.f32 %v1016_v54, %v1914_v42 }
 0x3a4   : > { %v1020_v55 = vpop.f32.mrf.mxu1 }
 0x3a5   : > { %v1189_v40 = vmul.f32 %v1020_v55, %v1927_v45 }
 0x3a6   : > { %v1022_v57 = vpop.f32.mrf.mxu1 }
 0x3a7   : > { %v1190_v43 = vmul.f32 %v1022_v57, %v1922_v44 }
 0x3a8   : > { %v1026_v0 = vpop.f32.mrf.mxu1 }
 0x3a9   : > { %v1191_v6 = vmul.f32 %v1026_v0, %v1935_v47 }
 0x3aa   : > { %v1028_v3 = vpop.f32.mrf.mxu1 }
 0x3ab   : > { %v1192_v37 = vmul.f32 %v1028_v3, %v1930_v46 }
 0x3ff   : > { %v1130_v56 = vpop.f32.mrf.mxu0 }
 0x400   : > { %v1193_v59 = vmul.f32 %v1177_v48, %v1130_v56 }
 0x401   : > { %v1132_v60 = vpop.f32.mrf.mxu0 }
 0x402   : > { %1209 = vst [vmem:[%s2086_s15] sm:$0xff] %v1193_v59  ;;  %v1194_v62 = vmul.f32 %v1178_v58, %v1132_v60 }
 0x403   : > { %v1136_v63 = vpop.f32.mrf.mxu0 }
 0x404   : > { %1210 = vst [vmem:[%s2086_s15 + $0x8] sm:$0xff] %v1194_v62  ;;  %v1195_v1 = vmul.f32 %v1179_v61, %v1136_v63 }
 0x405   : > { %v1138_v13 = vpop.f32.mrf.mxu0 }
 0x406   : > { %1211 = vst [vmem:[%s2086_s15 + $0x10] sm:$0xff] %v1195_v1  ;;  %v1196_v35 = vmul.f32 %v1180_v33, %v1138_v13 }
 0x407   : > { %v1142_v4 = vpop.f32.mrf.mxu0 }
 0x408   : > { %1212 = vst [vmem:[%s2086_s15 + $0x18] sm:$0xff] %v1196_v35  ;;  %v1197_v7 = vmul.f32 %v1181_v2, %v1142_v4 }
 0x409   : > { %v1144_v8 = vpop.f32.mrf.mxu0  ;;  %v1172_v34 = vpop.f32.mrf.mxu1 }
 0x40a   : > { %1213 = vst [vmem:[%s2086_s15 + $0x20] sm:$0xff] %v1197_v7  ;;  %v1198_v10 = vmul.f32 %v1182_v5, %v1144_v8  ;;  %v1207_v11 = vmul.f32 %v1191_v6, %v1172_v34 }
 0x40b   : > { %v1148_v12 = vpop.f32.mrf.mxu0  ;;  %v1174_v14 = vpop.f32.mrf.mxu1 }
 0x40c   : > { %1214 = vst [vmem:[%s2086_s15 + $0x28] sm:$0xff] %v1198_v10  ;;  %1223 = vst [vmem:[%s2086_s15 + $0x70] sm:$0xff] %v1207_v11  ;;  %v1199_v47 = vmul.f32 %v1183_v9, %v1148_v12  ;;  %v1208_v15 = vmul.f32 %v1192_v37, %v1174_v14 }
 0x40d   : > { %v1150_v16 = vpop.f32.mrf.mxu0 }
 0x40e   : > { %1215 = vst [vmem:[%s2086_s15 + $0x30] sm:$0xff] %v1199_v47  ;;  %1224 = vst [vmem:[%s2086_s15 + $0x78] sm:$0xff] %v1208_v15  ;;  %v1200_v39 = vmul.f32 %v1184_v36, %v1150_v16 }
 0x40f   : > { %v1154_v46 = vpop.f32.mrf.mxu0 }
 0x410   : > { %1216 = vst [vmem:[%s2086_s15 + $0x38] sm:$0xff] %v1200_v39  ;;  %v1201_v38 = vmul.f32 %v1185_v17, %v1154_v46 }
 0x411   : > { %v1156_v19 = vpop.f32.mrf.mxu0 }
 0x412   : > { %1217 = vst [vmem:[%s2086_s15 + $0x40] sm:$0xff] %v1201_v38  ;;  %v1202_v21 = vmul.f32 %v1186_v18, %v1156_v19 }
 0x413   : > { %v1160_v22 = vpop.f32.mrf.mxu0 }
 0x414   : > { %1218 = vst [vmem:[%s2086_s15 + $0x48] sm:$0xff] %v1202_v21  ;;  %v1203_v23 = vmul.f32 %v1187_v20, %v1160_v22 }
 0x415   : > { %v1162_v24 = vpop.f32.mrf.mxu0 }
 0x416   : > { %1219 = vst [vmem:[%s2086_s15 + $0x50] sm:$0xff] %v1203_v23  ;;  %v1204_v25 = vmul.f32 %v1188_v41, %v1162_v24 }
 0x417   : > { %v1166_v26 = vpop.f32.mrf.mxu0 }
 0x418   : > { %1220 = vst [vmem:[%s2086_s15 + $0x58] sm:$0xff] %v1204_v25  ;;  %v1205_v27 = vmul.f32 %v1189_v40, %v1166_v26 }
 0x419   : > { %v1168_v28 = vpop.f32.mrf.mxu0 }
 0x41a   : > { %1221 = vst [vmem:[%s2086_s15 + $0x60] sm:$0xff] %v1205_v27  ;;  %v1206_v42 = vmul.f32 %v1190_v43, %v1168_v28 }
 0x41c   : > { %1222 = vst [vmem:[%s2086_s15 + $0x68] sm:$0xff] %v1206_v42 }
 0x41d   : > { %1629 = shalt.err (!%p1626_p3)
}
 0x41e   : > { %s1630_s19 = scalar_lea.hbm %s2120_s21, 2048  ;;  %s1634_s29 = scalar_lea.hbm %s2175_s7, 4096 }
 0x41f   : > { %p1631_p4 = scmp.ne.s32.totalorder %s2120_s21, %s1630_s19  ;;  %p1635_p9 = scmp.lt.s32.totalorder %s2120_s21, %s2175_s7 }
 0x420   : > { %p1636_p10 = scmp.lt.s32.totalorder %s1634_s29, %s1630_s19 }
 0x421   : > { %p1632_p7 = pnand %p1631_p4, %p1762_p5 }
 0x422   : > { %p1637_p11 = por %p1636_p10, %p1635_p9 }
 0x423   : > { %p1633_p8 = pneg %p1632_p7 }
 0x425   : > { %p1638_p12 = pnand %p1637_p11, %p1633_p8 }
 0x427   : > { %1641 = shalt.err (!%p1638_p12)
}
 0x428   : > { %s1682_s18 = smov 256   ;;  %s1683_s20 = smov 16  }
 0x429   : > { %1508 = dma.vmem_to_hbm [thread:$0]  (%p1762_p5), %s2122_s17, 2048, %s2120_s21, %s2128_s28, %s1682_s18, %s1682_s18, %s1683_s20  }
 0x42a PF: > { %p1514_p13 = scmp.ge.s32.totalorder %s1676_s27, 2  ;;  %s1255_s22 = sand.u32 1, %s1664_s24  }
 0x42b   : > { %s1256_s23 = scalar_lea.sflag [#allocation3], %s1255_s22 }
 0x42c   : > { %p1511_p0 = pnand %p1514_p13, %p1766_p6 }
 0x42e   : > { %p1512_p1 = pneg %p1511_p0 }
 0x430   : > { %1659 = dma.done.wait (%p1512_p1), %s1256_s23, 2048  }
 0x431   : > { %1661 = vsyncadd (%p1512_p1), %s1256_s23, 4294965248  ;;  %p17_p2 = scmp.ge.s32.totalorder %s1749_s30, 4   ;;  %s2178_s24 = smov %s1668_s25 }
 0x432   : > { %s2179_s25 = smov %s1672_s26  ;;  %s2180_s26 = smov %s1760_s10 }
 0x433   : > { %s2181_s27 = smov %s1749_s30  ;;  %19 = sbr.rel (!%p17_p2) target bundleno = 3 (0x3), region = 83 }
 0x438   :  { %1261 = vsyncpa [#allocation3], 1 }
 0x439   :  { %1263 = vsyncpa [#allocation3 + $0x1], 1 }

</bundles_post_ra>
